<compile_context>
chip_gen: v6e
topology: v6e:2x2x1
jax: 0.10.0
libtpu: 0.0.40
codegen_flags: <defaults>
</compile_context>

<pallas_src>
import jax
import jax.numpy as jnp
from jax.experimental import pallas as pl
from jax.experimental.pallas import tpu as pltpu

IN_F = 10
H1 = 8
H2 = 4
OUT_F = 3

LANE = 128         # padded feature width for weights (padded once at init)
SUBLANE = 8        # batch rows rounded up to a multiple of this
MAX_TILE_B = 1024  # batch rows processed per grid step


def _fnn_kernel(x_ref, w_ref, b_ref, o_ref, xpad_ref):
    """Fused 3-layer MLP forward for one batch tile.

    x_ref   : (TILE_B, IN_F)   un-padded input rows (streamed per grid step)
    w_ref   : (3, LANE, LANE)  zero-padded packed weights, (in, out) layout (resident)
    b_ref   : (3, LANE)        zero-padded packed biases (resident)
    o_ref   : (TILE_B, OUT_F)  output rows
    xpad_ref: (TILE_B, LANE)   VMEM staging buffer for lane-padded x
    """
    # Stage x into a lane-padded f32 buffer.  Padded contraction columns must be exactly
    # zero; re-zero every step so this holds on every core / every grid iteration.
    xpad_ref[...] = jnp.zeros_like(xpad_ref)
    xpad_ref[:, 0:IN_F] = x_ref[...]
    x = xpad_ref[...]

    h1 = jnp.dot(x, w_ref[0], preferred_element_type=jnp.float32) + b_ref[0:1, :]
    h1 = jnp.maximum(h1, 0.0)
    # dropout (eval mode) == identity

    h2 = jnp.dot(h1, w_ref[1], preferred_element_type=jnp.float32) + b_ref[1:2, :]
    h2 = jnp.maximum(h2, 0.0)
    # dropout (eval mode) == identity

    out = jnp.dot(h2, w_ref[2], preferred_element_type=jnp.float32) + b_ref[2:3, :]
    o_ref[...] = out[:, 0:OUT_F].astype(o_ref.dtype)


def prepare_params(params):
    """Pad + pack weights/biases ONCE (outside the per-call hot path).

    Weights are stored (in_features, out_features) so the kernel computes x @ W + b.
    """
    def pad_w(w):
        r, c = w.shape
        return jnp.pad(w.astype(jnp.float32), ((0, LANE - r), (0, LANE - c)))

    def pad_b(b):
        return jnp.pad(b.astype(jnp.float32), (0, LANE - b.shape[0]))

    w_packed = jnp.stack(
        [pad_w(params["w1"]), pad_w(params["w2"]), pad_w(params["w3"])]
    )  # (3, LANE, LANE)
    b_packed = jnp.stack(
        [pad_b(params["b1"]), pad_b(params["b2"]), pad_b(params["b3"])]
    )  # (3, LANE)
    return {"w": w_packed, "b": b_packed}


@jax.jit
def fnn_forward(x, packed):
    """x: (B, 10) float32.  packed: output of prepare_params()."""
    w, b = packed["w"], packed["b"]
    B = x.shape[0]

    # Pick a batch tile: up to MAX_TILE_B rows, always a multiple of 8 sublanes.
    b_rounded = ((B + SUBLANE - 1) // SUBLANE) * SUBLANE
    tile_b = min(MAX_TILE_B, b_rounded)
    Bp = ((B + tile_b - 1) // tile_b) * tile_b
    grid = (Bp // tile_b,)

    x_p = x.astype(jnp.float32)
    if Bp != B:
        x_p = jnp.pad(x_p, ((0, Bp - B), (0, 0)))  # batch rows only; no lane padding

    flops = 2 * Bp * (IN_F * H1 + H1 * H2 + H2 * OUT_F)
    bytes_accessed = 4 * (Bp * IN_F + 3 * LANE * LANE + 3 * LANE + Bp * OUT_F)

    out_p = pl.pallas_call(
        _fnn_kernel,
        out_shape=jax.ShapeDtypeStruct((Bp, OUT_F), jnp.float32),
        grid=grid,
        in_specs=[
            pl.BlockSpec((tile_b, IN_F), lambda i: (i, 0)),       # x: streamed
            pl.BlockSpec((3, LANE, LANE), lambda i: (0, 0, 0)),   # weights: resident
            pl.BlockSpec((3, LANE), lambda i: (0, 0)),            # biases: resident
        ],
        out_specs=pl.BlockSpec((tile_b, OUT_F), lambda i: (i, 0)),
        scratch_shapes=[pltpu.VMEM((tile_b, LANE), jnp.float32)],
        compiler_params=pltpu.CompilerParams(
            dimension_semantics=("parallel",),       # shard batch across TCs on v7x
            vmem_limit_bytes=16 * 1024 * 1024,       # per-step VMEM is < 1.5 MiB
        ),
        cost_estimate=pl.CostEstimate(
            flops=flops, transcendentals=0, bytes_accessed=bytes_accessed
        ),
    )(x_p, w, b)

    return out_p[:B]


def init_params(key):
    """Deterministic init mirroring nn.Linear default: U(-1/sqrt(fan_in), +)."""
    ks = jax.random.split(key, 6)

    def linear(kw, kb, fan_in, fan_out):
        bound = 1.0 / jnp.sqrt(jnp.float32(fan_in))
        # stored as (in, out) so the kernel can do x @ W
        wgt = jax.random.uniform(kw, (fan_in, fan_out), jnp.float32, -bound, bound)
        bias = jax.random.uniform(kb, (fan_out,), jnp.float32, -bound, bound)
        return wgt, bias

    w1, b1 = linear(ks[0], ks[1], IN_F, H1)
    w2, b2 = linear(ks[2], ks[3], H1, H2)
    w3, b3 = linear(ks[4], ks[5], H2, OUT_F)
    return {"w1": w1, "b1": b1, "w2": w2, "b2": b2, "w3": w3, "b3": b3}


def fnn_reference(x, params):
    """Pure-JAX reference for verification (eval-mode forward)."""
    h = jnp.maximum(x @ params["w1"] + params["b1"], 0.0)
    h = jnp.maximum(h @ params["w2"] + params["b2"], 0.0)
    return h @ params["w3"] + params["b3"]


if __name__ == "__main__":
    key = jax.random.PRNGKey(0)
    k_x, k_p = jax.random.split(key)

    batch = 8
    x = jax.random.normal(k_x, (batch, IN_F), dtype=jnp.float32)
    params = init_params(k_p)
    packed = prepare_params(params)   # pad/pack once, outside the hot path

    out = fnn_forward(x, packed)
    out = jax.block_until_ready(out)

    ref = fnn_reference(x, params)
    assert out.shape == (batch, OUT_F), out.shape
    assert jnp.allclose(out, ref, atol=1e-5, rtol=1e-5), (
        f"max abs err {jnp.max(jnp.abs(out - ref))}"
    )

    print("KERNEL_OK")
</pallas_src>

<mosaic_0001>
module attributes {stable_mosaic.version = 11 : i64} {
  func.func @_fnn_kernel(%arg0: i32, %arg1: memref<8x10xf32, #tpu.memory_space<vmem>>, %arg2: memref<3x128x128xf32, #tpu.memory_space<vmem>>, %arg3: memref<3x128xf32, #tpu.memory_space<vmem>>, %arg4: memref<8x3xf32, #tpu.memory_space<vmem>>, %arg5: memref<8x128xf32, #tpu.memory_space<vmem>>) attributes {dimension_semantics = [#tpu.dimension_semantics<parallel>], iteration_bounds = array<i64: 1>, scalar_prefetch = 0 : i64, scratch_operands = 1 : i64, tpu.core_type = #tpu.core_type<tc>, window_params = [{transform_indices = @transform_0, window_bounds = array<i64: 8, 10>}, {pipeline_mode = #tpu.pipeline_mode<synchronous>, transform_indices = @transform_1, window_bounds = array<i64: 3, 128, 128>}, {pipeline_mode = #tpu.pipeline_mode<synchronous>, transform_indices = @transform_2, window_bounds = array<i64: 3, 128>}, {transform_indices = @transform_3, window_bounds = array<i64: 8, 3>}]} {
    %cst = arith.constant 0.000000e+00 : f32
    %0 = vector.broadcast %cst : f32 to vector<8x128xf32>
    %c0 = arith.constant 0 : index
    %c0_0 = arith.constant 0 : index
    %1 = vector.load %arg5[%c0, %c0_0] : memref<8x128xf32, #tpu.memory_space<vmem>>, vector<8x128xf32>
    tpu.vector_store %arg5[%c0, %c0_0], %0 {strides = array<i32>} : memref<8x128xf32, #tpu.memory_space<vmem>>, vector<8x128xf32>,
    %c0_1 = arith.constant 0 : index
    %c0_2 = arith.constant 0 : index
    %2 = vector.load %arg1[%c0_1, %c0_2] : memref<8x10xf32, #tpu.memory_space<vmem>>, vector<8x10xf32>
    %c0_3 = arith.constant 0 : index
    %c0_4 = arith.constant 0 : index
    %3 = vector.load %arg5[%c0_3, %c0_4] : memref<8x128xf32, #tpu.memory_space<vmem>>, vector<8x10xf32>
    tpu.vector_store %arg5[%c0_3, %c0_4], %2 {strides = array<i32>} : memref<8x128xf32, #tpu.memory_space<vmem>>, vector<8x10xf32>,
    %c0_5 = arith.constant 0 : index
    %c0_6 = arith.constant 0 : index
    %4 = vector.load %arg5[%c0_5, %c0_6] : memref<8x128xf32, #tpu.memory_space<vmem>>, vector<8x128xf32>
    %c0_7 = arith.constant 0 : index
    %c0_8 = arith.constant 0 : index
    %c0_9 = arith.constant 0 : index
    %5 = vector.load %arg2[%c0_7, %c0_8, %c0_9] : memref<3x128x128xf32, #tpu.memory_space<vmem>>, vector<1x128x128xf32>
    %6 = vector.shape_cast %5 : vector<1x128x128xf32> to vector<128x128xf32>
    %cst_10 = arith.constant dense<0.000000e+00> : vector<8x128xf32>
    %7 = tpu.matmul %4, %6, %cst_10 {dimension_numbers = #tpu.dot_dimension_numbers<[1], [0], [0], [1], [0, 0, 1, 1], [], []>} : vector<8x128xf32>, vector<128x128xf32>, vector<8x128xf32> -> vector<8x128xf32>
    %c0_11 = arith.constant 0 : index
    %c0_12 = arith.constant 0 : index
    %8 = vector.load %arg3[%c0_11, %c0_12] : memref<3x128xf32, #tpu.memory_space<vmem>>, vector<1x128xf32>
    %9 = vector.broadcast %8 : vector<1x128xf32> to vector<8x128xf32>
    %10 = arith.addf %7, %9 : vector<8x128xf32>
    %cst_13 = arith.constant 0.000000e+00 : f32
    %11 = vector.broadcast %cst_13 : f32 to vector<8x128xf32>
    %12 = arith.maximumf %10, %11 : vector<8x128xf32>
    %c1 = arith.constant 1 : index
    %c0_14 = arith.constant 0 : index
    %c0_15 = arith.constant 0 : index
    %13 = vector.load %arg2[%c1, %c0_14, %c0_15] : memref<3x128x128xf32, #tpu.memory_space<vmem>>, vector<1x128x128xf32>
    %14 = vector.shape_cast %13 : vector<1x128x128xf32> to vector<128x128xf32>
    %cst_16 = arith.constant dense<0.000000e+00> : vector<8x128xf32>
    %15 = tpu.matmul %12, %14, %cst_16 {dimension_numbers = #tpu.dot_dimension_numbers<[1], [0], [0], [1], [0, 0, 1, 1], [], []>} : vector<8x128xf32>, vector<128x128xf32>, vector<8x128xf32> -> vector<8x128xf32>
    %c1_17 = arith.constant 1 : index
    %c0_18 = arith.constant 0 : index
    %16 = vector.load %arg3[%c1_17, %c0_18] : memref<3x128xf32, #tpu.memory_space<vmem>>, vector<1x128xf32>
    %17 = vector.broadcast %16 : vector<1x128xf32> to vector<8x128xf32>
    %18 = arith.addf %15, %17 : vector<8x128xf32>
    %cst_19 = arith.constant 0.000000e+00 : f32
    %19 = vector.broadcast %cst_19 : f32 to vector<8x128xf32>
    %20 = arith.maximumf %18, %19 : vector<8x128xf32>
    %c2 = arith.constant 2 : index
    %c0_20 = arith.constant 0 : index
    %c0_21 = arith.constant 0 : index
    %21 = vector.load %arg2[%c2, %c0_20, %c0_21] : memref<3x128x128xf32, #tpu.memory_space<vmem>>, vector<1x128x128xf32>
    %22 = vector.shape_cast %21 : vector<1x128x128xf32> to vector<128x128xf32>
    %cst_22 = arith.constant dense<0.000000e+00> : vector<8x128xf32>
    %23 = tpu.matmul %20, %22, %cst_22 {dimension_numbers = #tpu.dot_dimension_numbers<[1], [0], [0], [1], [0, 0, 1, 1], [], []>} : vector<8x128xf32>, vector<128x128xf32>, vector<8x128xf32> -> vector<8x128xf32>
    %c2_23 = arith.constant 2 : index
    %c0_24 = arith.constant 0 : index
    %24 = vector.load %arg3[%c2_23, %c0_24] : memref<3x128xf32, #tpu.memory_space<vmem>>, vector<1x128xf32>
    %25 = vector.broadcast %24 : vector<1x128xf32> to vector<8x128xf32>
    %26 = arith.addf %23, %25 : vector<8x128xf32>
    %27 = vector.extract_strided_slice %26 {offsets = [0, 0], sizes = [8, 3], strides = [1, 1]} : vector<8x128xf32> to vector<8x3xf32>
    %c0_25 = arith.constant 0 : index
    %c0_26 = arith.constant 0 : index
    %28 = vector.load %arg4[%c0_25, %c0_26] : memref<8x3xf32, #tpu.memory_space<vmem>>, vector<8x3xf32>
    tpu.vector_store %arg4[%c0_25, %c0_26], %27 {strides = array<i32>} : memref<8x3xf32, #tpu.memory_space<vmem>>, vector<8x3xf32>,
    return
  }
  func.func @transform_0(%arg0: i32) -> (i32, i32) {
    %c0_i32 = arith.constant 0 : i32
    %c0_i32_0 = arith.constant 0 : i32
    return %arg0, %c0_i32 : i32, i32
  }
  func.func @transform_1(%arg0: i32) -> (i32, i32, i32) {
    %c0_i32 = arith.constant 0 : i32
    %c0_i32_0 = arith.constant 0 : i32
    %c0_i32_1 = arith.constant 0 : i32
    %c0_i32_2 = arith.constant 0 : i32
    return %c0_i32, %c0_i32_0, %c0_i32_1 : i32, i32, i32
  }
  func.func @transform_2(%arg0: i32) -> (i32, i32) {
    %c0_i32 = arith.constant 0 : i32
    %c0_i32_0 = arith.constant 0 : i32
    %c0_i32_1 = arith.constant 0 : i32
    return %c0_i32, %c0_i32_0 : i32, i32
  }
  func.func @transform_3(%arg0: i32) -> (i32, i32) {
    %c0_i32 = arith.constant 0 : i32
    %c0_i32_0 = arith.constant 0 : i32
    return %arg0, %c0_i32 : i32, i32
  }
}

</mosaic_0001>

<bundles_post_ra>
// kernel: fnn_forward.1
= control target key start
LH: loop header
LB: loop body
LE: loop exit
PB: predicated region body
PF: predicated region fallthrough
CT: control target
= control target key end

     0   :  { %8 = vsyncpa [#allocation4], 0  ;;  %s665_s0 = inlined_call_operand.hbm [shape: f32[8,10], index: 0, kind: input, shape index: {}]   ;;  %s666_s1 = inlined_call_operand.hbm [shape: f32[3,128,128], index: 1, kind: input, shape index: {}]   ;;  %s667_s2 = inlined_call_operand.hbm [shape: f32[3,128], index: 2, kind: input, shape index: {}]   ;;  %s668_s3 = inlined_call_operand.vmem [shape: f32[8,3], index: 3, kind: output, shape index: {}]  }
   0x1   :  { %9 = vsyncpa [#allocation6], 0  ;;  %s571_s12 = smov [#allocation5]  }
   0x2   :  { %s25_s13 = sshll.u32 %s571_s12, 4  ;;  %s26_s13 = int_to_ptr.vmem [resolvable:$true] %s25_s13 }
   0x3   :  { %s515_s14 = scalar_lea.vmem %s26_s13, 6144  ;;  %p520_p1 = scmp.lt.s32.totalorder %s26_s13, %s26_s13 }
   0x4   :  { %p516_p0 = scmp.ne.s32.totalorder %s26_s13, %s515_s14  ;;  %p521_p2 = scmp.lt.s32.totalorder %s515_s14, %s515_s14 }
   0x6   :  { %p522_p3 = por %p521_p2, %p520_p1 }
   0x8   :  { %p523_p4 = pnand %p522_p3, %p516_p0 }
   0xa   :  { %526 = shalt.err (!%p523_p4)
}
   0xb   :  { %s572_s15 = smov 128   ;;  %s573_s16 = smov 8  }
   0xc   :  { %31 = dma.hbm_to_vmem [thread:$0]  %s666_s1, 6144, %s26_s13, [#allocation6], %s572_s15, %s572_s15, %s573_s16  }
   0xd   :  { %s574_s19 = smov [#allocation3]   ;;  %s575_s21 = smov [#allocation7]  }
   0xe   :  { %s16_s20 = sshll.u32 %s574_s19, 4  ;;  %s38_s22 = sshll.u32 %s575_s21, 4  ;;  %s17_s20 = int_to_ptr.vmem [resolvable:$true] %s16_s20  ;;  %s39_s22 = int_to_ptr.vmem [resolvable:$true] %s38_s22 }
   0xf   :  { %s535_s23 = scalar_lea.vmem %s17_s20, 128  ;;  %p540_p6 = scmp.lt.s32.totalorder %s17_s20, %s17_s20 }
  0x10   :  { %p536_p5 = scmp.ne.s32.totalorder %s17_s20, %s535_s23  ;;  %p541_p7 = scmp.lt.s32.totalorder %s535_s23, %s535_s23 }
  0x12   :  { %p542_p8 = por %p541_p7, %p540_p6 }
  0x14   :  { %p543_p9 = pnand %p542_p8, %p536_p5 }
  0x16   :  { %546 = shalt.err (!%p543_p9)
}
  0x17   :  { %19 = dma.hbm_to_vmem [thread:$0]  %s665_s0, 128, %s17_s20, [#allocation4]  }
  0x18   :  { %s555_s26 = scalar_lea.vmem %s39_s22, 64  ;;  %p560_p11 = scmp.lt.s32.totalorder %s39_s22, %s39_s22 }
  0x19   :  { %p556_p10 = scmp.ne.s32.totalorder %s39_s22, %s555_s26  ;;  %p561_p12 = scmp.lt.s32.totalorder %s555_s26, %s555_s26 }
  0x1b   :  { %p562_p13 = por %p561_p12, %p560_p11 }
  0x1d   :  { %p563_p0 = pnand %p562_p13, %p556_p10 }
  0x1f   :  { %566 = shalt.err (!%p563_p0)
}
  0x20   :  { %41 = dma.hbm_to_vmem [thread:$0]  %s667_s2, 64, %s39_s22, [#allocation6]  }
  0x21   :  { %567 = dma.done.wait [#allocation4], 128  }
  0x22   :  { %568 = vsyncadd [#allocation4], 4294967168 }
  0x23   :  { %569 = dma.done.wait [#allocation6], 6208  }
  0x24   :  { %570 = vsyncadd [#allocation6], 4294961088  ;;  %v576_v0 = vmov 0.0   ;;  %vm577_vm0 = vmmov 0   ;;  %v71_v1 = vld [vmem:[#allocation5 + $0x78] sm:$0xff]  ;;  %v70_v2 = vld [vmem:[#allocation5 + $0x70] sm:$0xff] }
  0x25   :  { %395 = vmatprep.subr.mxu0 %v576_v0  ;;  %51 = vst [vmem:[#allocation2] sm:$0xff] %v576_v0  ;;  %427 = vmatprep.mubr.msk.f32.mxu0 %vm577_vm0, %v576_v0  ;;  %v69_v3 = vld [vmem:[#allocation5 + $0x68] sm:$0xff]  ;;  %vm53_vm1 = vcmask 80896   ;;  %v68_v4 = vld [vmem:[#allocation5 + $0x60] sm:$0xff]  ;;  %v52_v5 = vld [vmem:[#allocation3] sm:$0xff]  ;;  %vm333_vm2 = vcmask 23552  }
  0x26   :  { %430 = vmatprep.subr.mxu1 %v576_v0  ;;  %462 = vmatprep.mubr.msk.f32.mxu1 %vm577_vm0, %v576_v0  ;;  %v164_v6 = vld [vmem:[#allocation5 + $0xf8] sm:$0xff]  ;;  %54 = vst.msk [vmem:[#allocation2] sm:$0xff] %vm53_vm1, %v52_v5  ;;  %v163_v8 = vld [vmem:[#allocation5 + $0xf0] sm:$0xff]  ;;  %v162_v9 = vld [vmem:[#allocation5 + $0xe8] sm:$0xff] }
  0x27   :  { %396 = vmatpush3.msra.mxu0 %v71_v1  ;;  %v67_v7 = vld [vmem:[#allocation5 + $0x58] sm:$0xff]  ;;  %431 = vmatpush3.msra.mxu1 %v164_v6  ;;  %v66_v10 = vld [vmem:[#allocation5 + $0x50] sm:$0xff]  ;;  %v161_v11 = vld [vmem:[#allocation5 + $0xe0] sm:$0xff] }
  0x28   :  { %397 = vmatprep.subr.mxu0 %v576_v0  ;;  %432 = vmatprep.subr.mxu1 %v576_v0  ;;  %v65_v12 = vld [vmem:[#allocation5 + $0x48] sm:$0xff]  ;;  %v160_v13 = vld [vmem:[#allocation5 + $0xd8] sm:$0xff]  ;;  %v64_v14 = vld [vmem:[#allocation5 + $0x40] sm:$0xff] }
  0x29   :  { %398 = vmatpush3.msra.mxu0 %v70_v2  ;;  %433 = vmatpush3.msra.mxu1 %v163_v8  ;;  %v159_v15 = vld [vmem:[#allocation5 + $0xd0] sm:$0xff]  ;;  %v63_v16 = vld [vmem:[#allocation5 + $0x38] sm:$0xff]  ;;  %v158_v17 = vld [vmem:[#allocation5 + $0xc8] sm:$0xff] }
  0x2a   :  { %399 = vmatprep.subr.mxu0 %v576_v0  ;;  %434 = vmatprep.subr.mxu1 %v576_v0  ;;  %v62_v18 = vld [vmem:[#allocation5 + $0x30] sm:$0xff]  ;;  %v157_v19 = vld [vmem:[#allocation5 + $0xc0] sm:$0xff]  ;;  %v61_v20 = vld [vmem:[#allocation5 + $0x28] sm:$0xff] }
  0x2b   :  { %400 = vmatpush3.msra.mxu0 %v69_v3  ;;  %435 = vmatpush3.msra.mxu1 %v162_v9  ;;  %v156_v21 = vld [vmem:[#allocation5 + $0xb8] sm:$0xff]  ;;  %v60_v22 = vld [vmem:[#allocation5 + $0x20] sm:$0xff]  ;;  %v155_v23 = vld [vmem:[#allocation5 + $0xb0] sm:$0xff] }
  0x2c   :  { %401 = vmatprep.subr.mxu0 %v576_v0  ;;  %436 = vmatprep.subr.mxu1 %v576_v0  ;;  %v59_v24 = vld [vmem:[#allocation5 + $0x18] sm:$0xff]  ;;  %v154_v25 = vld [vmem:[#allocation5 + $0xa8] sm:$0xff]  ;;  %v58_v26 = vld [vmem:[#allocation5 + $0x10] sm:$0xff] }
  0x2d   :  { %402 = vmatpush3.msra.mxu0 %v68_v4  ;;  %437 = vmatpush3.msra.mxu1 %v161_v11  ;;  %v153_v27 = vld [vmem:[#allocation5 + $0xa0] sm:$0xff]  ;;  %v57_v28 = vld [vmem:[#allocation5 + $0x8] sm:$0xff]  ;;  %v152_v29 = vld [vmem:[#allocation5 + $0x98] sm:$0xff] }
  0x2e   :  { %403 = vmatprep.subr.mxu0 %v576_v0  ;;  %438 = vmatprep.subr.mxu1 %v576_v0  ;;  %v56_v30 = vld [vmem:[#allocation5] sm:$0xff]  ;;  %v55_v31 = vld [vmem:[#allocation2] sm:$0xff]  ;;  %v150_v33 = vld [vmem:[#allocation5 + $0x88] sm:$0xff] }
  0x2f   :  { %404 = vmatpush3.msra.mxu0 %v67_v7  ;;  %439 = vmatpush3.msra.mxu1 %v160_v13  ;;  %v151_v32 = vld [vmem:[#allocation5 + $0x90] sm:$0xff]  ;;  %v149_v34 = vld [vmem:[#allocation5 + $0x80] sm:$0xff]  ;;  %v257_v35 = vld [vmem:[#allocation5 + $0x178] sm:$0xff] }
  0x30   :  { %405 = vmatprep.subr.mxu0 %v576_v0  ;;  %440 = vmatprep.subr.mxu1 %v576_v0  ;;  %v256_v36 = vld [vmem:[#allocation5 + $0x170] sm:$0xff]  ;;  %v255_v37 = vld [vmem:[#allocation5 + $0x168] sm:$0xff]  ;;  %v254_v38 = vld [vmem:[#allocation5 + $0x160] sm:$0xff] }
  0x31   :  { %406 = vmatpush3.msra.mxu0 %v66_v10  ;;  %441 = vmatpush3.msra.mxu1 %v159_v15  ;;  %v253_v39 = vld [vmem:[#allocation5 + $0x158] sm:$0xff]  ;;  %v252_v40 = vld [vmem:[#allocation5 + $0x150] sm:$0xff]  ;;  %v251_v41 = vld [vmem:[#allocation5 + $0x148] sm:$0xff] }
  0x32   :  { %407 = vmatprep.subr.mxu0 %v576_v0  ;;  %442 = vmatprep.subr.mxu1 %v576_v0  ;;  %v250_v42 = vld [vmem:[#allocation5 + $0x140] sm:$0xff]  ;;  %v249_v43 = vld [vmem:[#allocation5 + $0x138] sm:$0xff]  ;;  %v248_v44 = vld [vmem:[#allocation5 + $0x130] sm:$0xff] }
  0x33   :  { %408 = vmatpush3.msra.mxu0 %v65_v12  ;;  %443 = vmatpush3.msra.mxu1 %v158_v17  ;;  %v247_v45 = vld [vmem:[#allocation5 + $0x128] sm:$0xff]  ;;  %v246_v46 = vld [vmem:[#allocation5 + $0x120] sm:$0xff]  ;;  %v245_v47 = vld [vmem:[#allocation5 + $0x118] sm:$0xff] }
  0x34   :  { %409 = vmatprep.subr.mxu0 %v576_v0  ;;  %444 = vmatprep.subr.mxu1 %v576_v0  ;;  %v341_v48 = vld [vmem:[#allocation7] ss:$0 sm:$0xff]  ;;  %v244_v53 = vld [vmem:[#allocation5 + $0x110] sm:$0xff]  ;;  %v243_v54 = vld [vmem:[#allocation5 + $0x108] sm:$0xff] }
  0x35   :  { %410 = vmatpush3.msra.mxu0 %v64_v14  ;;  %445 = vmatpush3.msra.mxu1 %v157_v19  ;;  %v242_v55 = vld [vmem:[#allocation5 + $0x100] sm:$0xff] }
  0x36   :  { %411 = vmatprep.subr.mxu0 %v576_v0  ;;  %446 = vmatprep.subr.mxu1 %v576_v0  ;;  %v342_v56 = vld [vmem:[#allocation7 + $0x1] ss:$0 sm:$0xff]  ;;  %v343_v61 = vld [vmem:[#allocation7 + $0x2] ss:$0 sm:$0xff] }
  0x37   :  { %412 = vmatpush3.msra.mxu0 %v63_v16  ;;  %447 = vmatpush3.msra.mxu1 %v156_v21 }
  0x38   :  { %413 = vmatprep.subr.mxu0 %v576_v0  ;;  %448 = vmatprep.subr.mxu1 %v576_v0 }
  0x39   :  { %414 = vmatpush3.msra.mxu0 %v62_v18  ;;  %449 = vmatpush3.msra.mxu1 %v155_v23 }
  0x3a   :  { %415 = vmatprep.subr.mxu0 %v576_v0  ;;  %450 = vmatprep.subr.mxu1 %v576_v0 }
  0x3b   :  { %416 = vmatpush3.msra.mxu0 %v61_v20  ;;  %451 = vmatpush3.msra.mxu1 %v154_v25 }
  0x3c   :  { %417 = vmatprep.subr.mxu0 %v576_v0  ;;  %452 = vmatprep.subr.mxu1 %v576_v0 }
  0x3d   :  { %418 = vmatpush3.msra.mxu0 %v60_v22  ;;  %453 = vmatpush3.msra.mxu1 %v153_v27 }
  0x3e   :  { %419 = vmatprep.subr.mxu0 %v576_v0  ;;  %454 = vmatprep.subr.mxu1 %v576_v0 }
  0x3f   :  { %420 = vmatpush3.msra.mxu0 %v59_v24  ;;  %455 = vmatpush3.msra.mxu1 %v152_v29 }
  0x40   :  { %421 = vmatprep.subr.mxu0 %v576_v0  ;;  %456 = vmatprep.subr.mxu1 %v576_v0 }
  0x41   :  { %422 = vmatpush3.msra.mxu0 %v58_v26  ;;  %457 = vmatpush3.msra.mxu1 %v151_v32 }
  0x42   :  { %423 = vmatprep.subr.mxu0 %v576_v0  ;;  %458 = vmatprep.subr.mxu1 %v576_v0 }
  0x43   :  { %424 = vmatpush3.msra.mxu0 %v57_v28  ;;  %459 = vmatpush3.msra.mxu1 %v150_v33 }
  0x44   :  { %425 = vmatprep.subr.mxu0 %v576_v0  ;;  %460 = vmatprep.subr.mxu1 %v576_v0 }
  0x45   :  { %426 = vmatpush3.msra.mxu0 %v56_v30  ;;  %461 = vmatpush3.msra.mxu1 %v149_v34 }
  0x46   :  { %428 = vmatmul.mubr.f32.vlgmr.msra.gmra.mxu0 %v55_v31  ;;  %465 = vmatprep.subr.mxu0 %v576_v0 }
  0x47   :  { %497 = vmatprep.mubr.msk.f32.mxu0 %vm577_vm0, %v576_v0  ;;  %466 = vmatpush3.msra.mxu0 %v257_v35 }
  0x48   :  { %467 = vmatprep.subr.mxu0 %v576_v0 }
  0x49   :  { %468 = vmatpush3.msra.mxu0 %v256_v36 }
  0x4a   :  { %469 = vmatprep.subr.mxu0 %v576_v0 }
  0x4b   :  { %470 = vmatpush3.msra.mxu0 %v255_v37 }
  0x4c   :  { %471 = vmatprep.subr.mxu0 %v576_v0 }
  0x4d   :  { %472 = vmatpush3.msra.mxu0 %v254_v38 }
  0x4e   :  { %473 = vmatprep.subr.mxu0 %v576_v0 }
  0x4f   :  { %474 = vmatpush3.msra.mxu0 %v253_v39 }
  0x50   :  { %475 = vmatprep.subr.mxu0 %v576_v0 }
  0x51   :  { %476 = vmatpush3.msra.mxu0 %v252_v40 }
  0x52   :  { %477 = vmatprep.subr.mxu0 %v576_v0 }
  0x53   :  { %478 = vmatpush3.msra.mxu0 %v251_v41 }
  0x54   :  { %479 = vmatprep.subr.mxu0 %v576_v0 }
  0x55   :  { %480 = vmatpush3.msra.mxu0 %v250_v42 }
  0x56   :  { %481 = vmatprep.subr.mxu0 %v576_v0 }
  0x57   :  { %482 = vmatpush3.msra.mxu0 %v249_v43 }
  0x58   :  { %483 = vmatprep.subr.mxu0 %v576_v0 }
  0x59   :  { %484 = vmatpush3.msra.mxu0 %v248_v44 }
  0x5a   :  { %485 = vmatprep.subr.mxu0 %v576_v0 }
  0x5b   :  { %486 = vmatpush3.msra.mxu0 %v247_v45 }
  0x5c   :  { %487 = vmatprep.subr.mxu0 %v576_v0 }
  0x5d   :  { %488 = vmatpush3.msra.mxu0 %v246_v46 }
  0x5e   :  { %489 = vmatprep.subr.mxu0 %v576_v0 }
  0x5f   :  { %490 = vmatpush3.msra.mxu0 %v245_v47 }
  0x60   :  { %491 = vmatprep.subr.mxu0 %v576_v0 }
  0x61   :  { %492 = vmatpush3.msra.mxu0 %v244_v53 }
  0x62   :  { %493 = vmatprep.subr.mxu0 %v576_v0 }
  0x63   :  { %494 = vmatpush3.msra.mxu0 %v243_v54 }
  0x64   :  { %495 = vmatprep.subr.mxu0 %v576_v0 }
  0x65   :  { %496 = vmatpush3.msra.mxu0 %v242_v55 }
 0x106   :  { %v143_v49 = vpop.f32.mrf.mxu0 }
 0x107   :  { %v144_v50 = vadd.f32 %v341_v48, %v143_v49 }
 0x108   :  { %v429_v51 = vpop.f32.mrf.mxu0 }
 0x109   :  { %v147_v52 = vmax.f32 %v144_v50, 0.0 }
 0x10b   :  { %463 = vmatmul.mubr.f32.vlgmr.msra.gmra.mxu1 %v147_v52 }
 0x1cb   :  { %v236_v57 = vpop.f32.mrf.mxu1 }
 0x1cc   :  { %v237_v58 = vadd.f32 %v342_v56, %v236_v57 }
 0x1cd   :  { %v464_v59 = vpop.f32.mrf.mxu1 }
 0x1ce   :  { %v240_v60 = vmax.f32 %v237_v58, 0.0 }
 0x1d0   :  { %498 = vmatmul.mubr.f32.vlgmr.msra.gmra.mxu0 %v240_v60 }
 0x290   :  { %v329_v62 = vpop.f32.mrf.mxu0 }
 0x291   :  { %v330_v63 = vadd.f32 %v343_v61, %v329_v62 }
 0x292   :  { %v499_v1 = vpop.f32.mrf.mxu0 }
 0x293   :  { %334 = vst.msk [vmem:[%s668_s3] sm:$0xff] %vm333_vm2, %v330_v63 }
 0x294   :  { %339 = vsyncpa [#allocation4], 1 }
 0x295   :  { %340 = vsyncpa [#allocation6], 1 }

</bundles_post_ra>
